<compile_context>
chip_gen: v7x
topology: tpu7x:2x2x1
jax: 0.10.0
libtpu: 0.0.40
codegen_flags: <defaults>
</compile_context>

<pallas_src>
import functools

import jax
import jax.numpy as jnp
import numpy as np
from jax.experimental import pallas as pl
from jax.experimental.pallas import tpu as pltpu

QUANT_MIN = 0.0
QUANT_MAX = 255.0
F32_EPS = float(jnp.finfo(jnp.float32).eps)  # torch.finfo(torch.float32).eps

LANE = 512          # lane-dense last dim (multiple of 128) -> unmasked vst on full blocks
_SUBLANE = 8


# ----------------------------- generation-aware sizing (static) ---------------------------------
@functools.lru_cache(maxsize=None)
def _gen_config():
    try:
        vmem_cap = int(pltpu.get_tpu_info().vmem_capacity_bytes)
    except Exception:
        vmem_cap = 64 * 1024 * 1024  # conservative (v7x-sized) fallback
    if vmem_cap >= 100 * 1024 * 1024:
        # v5e / v6e: 128 MiB physical VMEM -> big tiles, bigger fused cutoff
        return {
            "fused_slab_bytes": 12 * 1024 * 1024,  # f32-equivalent slab cap for fused path
            "block_bytes": 8 * 1024 * 1024,        # streaming tile for the two-pass path
            "vmem_limit": 96 * 1024 * 1024,
        }
    # v7x: 64 MiB physical VMEM -> stay well under it (double-buffered in+out blocks)
    return {
        "fused_slab_bytes": 6 * 1024 * 1024,
        "block_bytes": 4 * 1024 * 1024,
        "vmem_limit": 48 * 1024 * 1024,
    }


def _ceil_to(v, m):
    return ((v + m - 1) // m) * m


def _pick_tile_rows(rows, block_bytes):
    tr = max(_SUBLANE, (block_bytes // (LANE * 4) // _SUBLANE) * _SUBLANE)
    return min(tr, _ceil_to(max(rows, 1), _SUBLANE))


# ------------------- MinMaxObserver.calculate_qparams (scalar glue, plain JAX) ------------------
def _qparams_from_minmax(min_val, max_val):
    min_val = min_val.astype(jnp.float32)
    max_val = max_val.astype(jnp.float32)
    same = max_val == min_val  # degenerate range -> scale=1, zero_point=0 (MinMaxObserver)
    mn = jnp.minimum(min_val, 0.0)
    mx = jnp.maximum(max_val, 0.0)
    scale = jnp.maximum((mx - mn) / (QUANT_MAX - QUANT_MIN), F32_EPS)
    zp = jnp.clip(QUANT_MIN - jnp.round(mn / scale), QUANT_MIN, QUANT_MAX)
    scale = jnp.where(same, jnp.float32(1.0), scale)
    zp = jnp.where(same, jnp.float32(0.0), zp)
    return scale, zp


def _fq_jax(x, scale, zp):
    """Plain-JAX fake quant (used only for the tiny <512-element ragged tail)."""
    xf = x.astype(jnp.float32)
    q = jnp.clip(jnp.round(xf * (1.0 / scale) + zp), QUANT_MIN, QUANT_MAX)
    return (q - zp) * scale


# ----------------------- Kernel A: fused single-pass (observer + fake quant) --------------------
def _fused_kernel(x_ref, o_ref, scale_ref, zp_ref):
    x = x_ref[...]
    # Reduce axis=0 FIRST: VPU elementwise tree over rows; the only cross-lane (XLU)
    # reduce is on the final (1, LANE) row.  Compares stay in the native dtype.
    col_min = jnp.min(x, axis=0, keepdims=True)                         # (1, LANE)
    col_max = jnp.max(x, axis=0, keepdims=True)
    mn = jnp.min(col_min, axis=1, keepdims=True).astype(jnp.float32)    # (1, 1)
    mx = jnp.max(col_max, axis=1, keepdims=True).astype(jnp.float32)

    same = mx == mn
    mn0 = jnp.minimum(mn, 0.0)
    mx0 = jnp.maximum(mx, 0.0)
    scale = jnp.maximum((mx0 - mn0) / (QUANT_MAX - QUANT_MIN), F32_EPS)
    zp = jnp.clip(QUANT_MIN - jnp.round(mn0 / scale), QUANT_MIN, QUANT_MAX)
    scale = jnp.where(same, jnp.float32(1.0), scale)
    zp = jnp.where(same, jnp.float32(0.0), zp)

    inv_scale = 1.0 / scale
    xf = x.astype(jnp.float32)
    q = jnp.clip(jnp.round(xf * inv_scale + zp), QUANT_MIN, QUANT_MAX)
    o_ref[...] = ((q - zp) * scale).astype(o_ref.dtype)
    scale_ref[...] = scale
    zp_ref[...] = zp


def _forward_fused(x2d, out_dtype, cfg):
    rows, lane = x2d.shape
    # TODO(synk): near the fused-size cap a row-blocked streaming variant would overlap the
    # observer's input DMA with compute; for small slabs the serialization is acceptable.
    out, scale, zp = pl.pallas_call(
        _fused_kernel,
        out_shape=(
            jax.ShapeDtypeStruct((rows, lane), out_dtype),
            jax.ShapeDtypeStruct((1, 1), jnp.float32),
            jax.ShapeDtypeStruct((1, 1), jnp.float32),
        ),
        grid=(1,),
        in_specs=[pl.BlockSpec((rows, lane), lambda i: (0, 0))],
        out_specs=(
            pl.BlockSpec((rows, lane), lambda i: (0, 0)),
            pl.BlockSpec((1, 1), lambda i: (0, 0)),
            pl.BlockSpec((1, 1), lambda i: (0, 0)),
        ),
        compiler_params=pltpu.CompilerParams(
            dimension_semantics=("arbitrary",),
            vmem_limit_bytes=cfg["vmem_limit"],
        ),
    )(x2d)
    return out, scale[0, 0], zp[0, 0]


# ------------- Kernel B1: observer (per-block vector partial min/max, "parallel") ---------------
def _minmax_partial_kernel(x_ref, pmin_ref, pmax_ref, *, total_rows, tr):
    x = x_ref[...]
    if total_rows % tr != 0:
        # Ragged last block: rows past the array end are undefined -> mask them so they
        # cannot corrupt the global min/max.
        valid = total_rows - pl.program_id(0) * tr
        row_id = jax.lax.broadcasted_iota(jnp.int32, x.shape, 0)
        in_range = row_id < valid
        x_min = jnp.where(in_range, x, jnp.asarray(jnp.inf, x.dtype))
        x_max = jnp.where(in_range, x, jnp.asarray(-jnp.inf, x.dtype))
    else:
        x_min = x_max = x
    # Sublane-aligned split (no relayout); reduce over axis 0 is a VPU elementwise tree.
    shape3 = (x.shape[0] // _SUBLANE, _SUBLANE, x.shape[1])
    pmin_ref[...] = jnp.min(x_min.reshape(shape3), axis=0).astype(jnp.float32)
    pmax_ref[...] = jnp.max(x_max.reshape(shape3), axis=0).astype(jnp.float32)


def _observe_minmax(x2d, tr, cfg):
    rows, lane = x2d.shape
    nb = -(-rows // tr)
    itemsize = x2d.dtype.itemsize
    kernel = functools.partial(_minmax_partial_kernel, total_rows=rows, tr=tr)
    pmin, pmax = pl.pallas_call(
        kernel,
        out_shape=(
            jax.ShapeDtypeStruct((nb * _SUBLANE, lane), jnp.float32),
            jax.ShapeDtypeStruct((nb * _SUBLANE, lane), jnp.float32),
        ),
        grid=(nb,),
        in_specs=[pl.BlockSpec((tr, lane), lambda i: (i, 0))],
        out_specs=(
            pl.BlockSpec((_SUBLANE, lane), lambda i: (i, 0)),
            pl.BlockSpec((_SUBLANE, lane), lambda i: (i, 0)),
        ),
        compiler_params=pltpu.CompilerParams(
            dimension_semantics=("parallel",),    # megacore-friendly on v7x
            vmem_limit_bytes=cfg["vmem_limit"],
        ),
        cost_estimate=pl.CostEstimate(
            flops=2 * rows * lane,
            transcendentals=0,
            bytes_accessed=rows * lane * itemsize + 2 * nb * _SUBLANE * lane * 4,
        ),
    )(x2d)
    # tiny final reduce over the partials (<< input size) in plain JAX
    return jnp.min(pmin), jnp.max(pmax)


# --------------------- Kernel B2: fake_quantize_per_tensor_affine (elementwise) -----------------
def _fq_kernel(params_ref, x_ref, o_ref):
    scale = params_ref[0]
    inv_scale = params_ref[1]
    zp = params_ref[2]
    xf = x_ref[...].astype(jnp.float32)
    q = jnp.clip(jnp.round(xf * inv_scale + zp), QUANT_MIN, QUANT_MAX)
    o_ref[...] = ((q - zp) * scale).astype(o_ref.dtype)


def _fake_quant(x2d, params, tr, out_dtype, cfg):
    rows, lane = x2d.shape
    nb = -(-rows // tr)
    in_bytes = x2d.dtype.itemsize
    out_bytes = jnp.dtype(out_dtype).itemsize
    return pl.pallas_call(
        _fq_kernel,
        out_shape=jax.ShapeDtypeStruct((rows, lane), out_dtype),
        grid=(nb,),
        in_specs=[
            pl.BlockSpec(memory_space=pltpu.MemorySpace.SMEM),  # (scale, 1/scale, zp)
            pl.BlockSpec((tr, lane), lambda i: (i, 0)),
        ],
        out_specs=pl.BlockSpec((tr, lane), lambda i: (i, 0)),
        compiler_params=pltpu.CompilerParams(
            dimension_semantics=("parallel",),
            vmem_limit_bytes=cfg["vmem_limit"],
        ),
        cost_estimate=pl.CostEstimate(
            flops=6 * rows * lane,
            transcendentals=0,
            bytes_accessed=rows * lane * (in_bytes + out_bytes),
        ),
    )(params, x2d)


# --------------------------------------- module forward -----------------------------------------
@functools.partial(jax.jit, static_argnames=("force_two_pass",))
def fake_quantize_forward(x, force_two_pass=False):
    """FakeQuantize.forward with enabled=True (observer -> qparams -> fake quant)."""
    n = x.size
    if n == 0:  # static shape guard
        return x, jnp.float32(1.0), jnp.int32(0)

    cfg = _gen_config()
    flat = x.reshape(-1)
    n_main = (n // LANE) * LANE     # LANE-aligned prefix handled by the kernels
    has_tail = n_main < n           # <512-element ragged tail handled in plain JAX

    if n_main == 0:
        # Tiny tensor (< LANE elements): not worth a kernel launch.
        scale, zpf = _qparams_from_minmax(jnp.min(flat), jnp.max(flat))
        out = _fq_jax(flat, scale, zpf).astype(x.dtype).reshape(x.shape)
        return out, scale, zpf.astype(jnp.int32)

    rows = n_main // LANE
    main2d = flat[:n_main].reshape(rows, LANE)   # free reshape when n is LANE-aligned

    use_fused = (not has_tail) and (n * 4 <= cfg["fused_slab_bytes"]) and (not force_two_pass)
    if use_fused:
        # Single pass: 1 HBM read + 1 write, qparams computed in-kernel.
        out2d, scale, zpf = _forward_fused(main2d, x.dtype, cfg)
        return out2d.reshape(x.shape), scale, zpf.astype(jnp.int32)

    # Two-pass streaming path for large (or non-aligned) tensors.
    tr = _pick_tile_rows(rows, cfg["block_bytes"])
    mn, mx = _observe_minmax(main2d, tr, cfg)
    if has_tail:
        tail = flat[n_main:]
        mn = jnp.minimum(mn, jnp.min(tail).astype(jnp.float32))
        mx = jnp.maximum(mx, jnp.max(tail).astype(jnp.float32))
    scale, zpf = _qparams_from_minmax(mn, mx)
    params = jnp.stack([scale, 1.0 / scale, zpf]).astype(jnp.float32)
    main_out = _fake_quant(main2d, params, tr, x.dtype, cfg)
    if has_tail:
        tail_out = _fq_jax(flat[n_main:], scale, zpf).astype(x.dtype)
        out = jnp.concatenate([main_out.reshape(-1), tail_out]).reshape(x.shape)
    else:
        out = main_out.reshape(x.shape)
    return out, scale, zpf.astype(jnp.int32)


# ------------------------------------------- main ------------------------------------------------
if __name__ == "__main__":
    key = jax.random.PRNGKey(0)
    x = jax.random.normal(key, (2, 4, 16, 16), dtype=jnp.float32) * 3.0

    # pure-JAX reference (MinMaxObserver + fake_quantize_per_tensor_affine semantics)
    def _reference(xr):
        sc, zp = _qparams_from_minmax(jnp.min(xr), jnp.max(xr))
        q = jnp.clip(jnp.round(xr.astype(jnp.float32) * (1.0 / sc) + zp), QUANT_MIN, QUANT_MAX)
        return ((q - zp) * sc).astype(xr.dtype), sc, zp

    y_ref, s_ref, z_ref = _reference(x)

    # default path: fused single-pass kernel (tensor fits comfortably in VMEM)
    y, scale, zero_point = fake_quantize_forward(x)
    jax.block_until_ready(y)
    np.testing.assert_allclose(np.asarray(y), np.asarray(y_ref), rtol=1e-6, atol=1e-6)
    np.testing.assert_allclose(float(scale), float(s_ref), rtol=1e-6)
    assert int(zero_point) == int(round(float(z_ref)))
    assert y.shape == x.shape and y.dtype == x.dtype

    # also exercise the tiled two-pass path used for large tensors
    y2, scale2, zp2 = fake_quantize_forward(x, force_two_pass=True)
    jax.block_until_ready(y2)
    np.testing.assert_allclose(np.asarray(y2), np.asarray(y_ref), rtol=1e-6, atol=1e-6)
    np.testing.assert_allclose(float(scale2), float(s_ref), rtol=1e-6)
    assert int(zp2) == int(round(float(z_ref)))

    # non-LANE-aligned shape: kernel on the aligned prefix + plain-JAX ragged tail (no padding)
    x3 = jax.random.normal(jax.random.PRNGKey(1), (2, 5, 60), dtype=jnp.float32) * 2.0  # 600 elems
    y3_ref, s3_ref, z3_ref = _reference(x3)
    y3, s3, z3 = fake_quantize_forward(x3, force_two_pass=True)
    jax.block_until_ready(y3)
    np.testing.assert_allclose(np.asarray(y3), np.asarray(y3_ref), rtol=1e-6, atol=1e-6)
    np.testing.assert_allclose(float(s3), float(s3_ref), rtol=1e-6)
    assert y3.shape == x3.shape and y3.dtype == x3.dtype

    print("KERNEL_OK")
</pallas_src>

<mosaic_0001>
module attributes {stable_mosaic.version = 11 : i64} {
  func.func @_fused_kernel(%arg0: i32, %arg1: memref<4x512xf32, #tpu.memory_space<vmem>>, %arg2: memref<4x512xf32, #tpu.memory_space<vmem>>, %arg3: memref<1x1xf32, #tpu.memory_space<vmem>>, %arg4: memref<1x1xf32, #tpu.memory_space<vmem>>) attributes {dimension_semantics = [#tpu.dimension_semantics<arbitrary>], iteration_bounds = array<i64: 1>, scalar_prefetch = 0 : i64, scratch_operands = 0 : i64, tpu.core_type = #tpu.core_type<tc>, window_params = [{pipeline_mode = #tpu.pipeline_mode<synchronous>, transform_indices = @transform_0, window_bounds = array<i64: 4, 512>}, {pipeline_mode = #tpu.pipeline_mode<synchronous>, transform_indices = @transform_1, window_bounds = array<i64: 4, 512>}, {pipeline_mode = #tpu.pipeline_mode<synchronous>, transform_indices = @transform_2, window_bounds = array<i64: 1, 1>}, {pipeline_mode = #tpu.pipeline_mode<synchronous>, transform_indices = @transform_3, window_bounds = array<i64: 1, 1>}]} {
    %c0 = arith.constant 0 : index
    %c0_0 = arith.constant 0 : index
    %0 = vector.load %arg1[%c0, %c0_0] : memref<4x512xf32, #tpu.memory_space<vmem>>, vector<4x512xf32>
    %cst = arith.constant dense<0x7F800000> : vector<512xf32>
    %1 = vector.multi_reduction <minimumf>, %0, %cst [0] : vector<4x512xf32> to vector<512xf32>
    %2 = vector.shape_cast %1 : vector<512xf32> to vector<1x512xf32>
    %cst_1 = arith.constant dense<0xFF800000> : vector<512xf32>
    %3 = vector.multi_reduction <maximumf>, %0, %cst_1 [0] : vector<4x512xf32> to vector<512xf32>
    %4 = vector.shape_cast %3 : vector<512xf32> to vector<1x512xf32>
    %cst_2 = arith.constant dense<0x7F800000> : vector<1xf32>
    %5 = vector.multi_reduction <minimumf>, %2, %cst_2 [1] : vector<1x512xf32> to vector<1xf32>
    %6 = vector.shape_cast %5 : vector<1xf32> to vector<1x1xf32>
    %cst_3 = arith.constant dense<0xFF800000> : vector<1xf32>
    %7 = vector.multi_reduction <maximumf>, %4, %cst_3 [1] : vector<1x512xf32> to vector<1xf32>
    %8 = vector.shape_cast %7 : vector<1xf32> to vector<1x1xf32>
    %9 = arith.cmpf oeq, %8, %6 : vector<1x1xf32>
    %cst_4 = arith.constant 0.000000e+00 : f32
    %10 = vector.broadcast %cst_4 : f32 to vector<1x1xf32>
    %11 = arith.minimumf %6, %10 : vector<1x1xf32>
    %cst_5 = arith.constant 0.000000e+00 : f32
    %12 = vector.broadcast %cst_5 : f32 to vector<1x1xf32>
    %13 = arith.maximumf %8, %12 : vector<1x1xf32>
    %14 = arith.subf %13, %11 : vector<1x1xf32>
    %cst_6 = arith.constant 2.550000e+02 : f32
    %15 = vector.broadcast %cst_6 : f32 to vector<1x1xf32>
    %16 = arith.divf %14, %15 : vector<1x1xf32>
    %cst_7 = arith.constant 1.1920929E-7 : f32
    %17 = vector.broadcast %cst_7 : f32 to vector<1x1xf32>
    %18 = arith.maximumf %16, %17 : vector<1x1xf32>
    %19 = arith.divf %11, %18 : vector<1x1xf32>
    %20 = math.roundeven %19 : vector<1x1xf32>
    %cst_8 = arith.constant 0.000000e+00 : f32
    %21 = vector.broadcast %cst_8 : f32 to vector<1x1xf32>
    %22 = arith.subf %21, %20 : vector<1x1xf32>
    %cst_9 = arith.constant 0.000000e+00 : f32
    %cst_10 = arith.constant 2.550000e+02 : f32
    %23 = vector.broadcast %cst_9 : f32 to vector<1x1xf32>
    %24 = arith.maximumf %23, %22 : vector<1x1xf32>
    %25 = vector.broadcast %cst_10 : f32 to vector<1x1xf32>
    %26 = arith.minimumf %25, %24 : vector<1x1xf32>
    %cst_11 = arith.constant 1.000000e+00 : f32
    %27 = vector.broadcast %cst_11 : f32 to vector<1x1xf32>
    %28 = arith.select %9, %27, %18 : vector<1x1xi1>, vector<1x1xf32>
    %cst_12 = arith.constant 0.000000e+00 : f32
    %29 = vector.broadcast %cst_12 : f32 to vector<1x1xf32>
    %30 = arith.select %9, %29, %26 : vector<1x1xi1>, vector<1x1xf32>
    %cst_13 = arith.constant 1.000000e+00 : f32
    %31 = vector.broadcast %cst_13 : f32 to vector<1x1xf32>
    %32 = arith.divf %31, %28 : vector<1x1xf32>
    %33 = vector.broadcast %32 : vector<1x1xf32> to vector<4x512xf32>
    %34 = arith.mulf %0, %33 : vector<4x512xf32>
    %35 = vector.broadcast %30 : vector<1x1xf32> to vector<4x512xf32>
    %36 = arith.addf %34, %35 : vector<4x512xf32>
    %37 = math.roundeven %36 : vector<4x512xf32>
    %cst_14 = arith.constant 0.000000e+00 : f32
    %cst_15 = arith.constant 2.550000e+02 : f32
    %38 = vector.broadcast %cst_14 : f32 to vector<4x512xf32>
    %39 = arith.maximumf %38, %37 : vector<4x512xf32>
    %40 = vector.broadcast %cst_15 : f32 to vector<4x512xf32>
    %41 = arith.minimumf %40, %39 : vector<4x512xf32>
    %42 = vector.broadcast %30 : vector<1x1xf32> to vector<4x512xf32>
    %43 = arith.subf %41, %42 : vector<4x512xf32>
    %44 = vector.broadcast %28 : vector<1x1xf32> to vector<4x512xf32>
    %45 = arith.mulf %43, %44 : vector<4x512xf32>
    %c0_16 = arith.constant 0 : index
    %c0_17 = arith.constant 0 : index
    %46 = vector.load %arg2[%c0_16, %c0_17] : memref<4x512xf32, #tpu.memory_space<vmem>>, vector<4x512xf32>
    tpu.vector_store %arg2[%c0_16, %c0_17], %45 {strides = array<i32>} : memref<4x512xf32, #tpu.memory_space<vmem>>, vector<4x512xf32>,
    %c0_18 = arith.constant 0 : index
    %c0_19 = arith.constant 0 : index
    %47 = vector.load %arg3[%c0_18, %c0_19] : memref<1x1xf32, #tpu.memory_space<vmem>>, vector<1x1xf32>
    tpu.vector_store %arg3[%c0_18, %c0_19], %28 {strides = array<i32>} : memref<1x1xf32, #tpu.memory_space<vmem>>, vector<1x1xf32>,
    %c0_20 = arith.constant 0 : index
    %c0_21 = arith.constant 0 : index
    %48 = vector.load %arg4[%c0_20, %c0_21] : memref<1x1xf32, #tpu.memory_space<vmem>>, vector<1x1xf32>
    tpu.vector_store %arg4[%c0_20, %c0_21], %30 {strides = array<i32>} : memref<1x1xf32, #tpu.memory_space<vmem>>, vector<1x1xf32>,
    return
  }
  func.func @transform_0(%arg0: i32) -> (i32, i32) {
    %c0_i32 = arith.constant 0 : i32
    %c0_i32_0 = arith.constant 0 : i32
    %c0_i32_1 = arith.constant 0 : i32
    return %c0_i32, %c0_i32_0 : i32, i32
  }
  func.func @transform_1(%arg0: i32) -> (i32, i32) {
    %c0_i32 = arith.constant 0 : i32
    %c0_i32_0 = arith.constant 0 : i32
    %c0_i32_1 = arith.constant 0 : i32
    return %c0_i32, %c0_i32_0 : i32, i32
  }
  func.func @transform_2(%arg0: i32) -> (i32, i32) {
    %c0_i32 = arith.constant 0 : i32
    %c0_i32_0 = arith.constant 0 : i32
    %c0_i32_1 = arith.constant 0 : i32
    return %c0_i32, %c0_i32_0 : i32, i32
  }
  func.func @transform_3(%arg0: i32) -> (i32, i32) {
    %c0_i32 = arith.constant 0 : i32
    %c0_i32_0 = arith.constant 0 : i32
    %c0_i32_1 = arith.constant 0 : i32
    return %c0_i32, %c0_i32_0 : i32, i32
  }
}

</mosaic_0001>

<bundles_post_ra>
// kernel: fake_quantize_forward.1
= control target key start
LH: loop header
LB: loop body
LE: loop exit
PB: predicated region body
PF: predicated region fallthrough
CT: control target
= control target key end

     0   :  { %9 = vsyncpa [#allocation3], 0  ;;  %vm21_vm0 = vcmask 1043456   ;;  %s299_s0 = inlined_call_operand.vmem [shape: f32[4,512], index: 0, kind: input, shape index: {}]   ;;  %s300_s1 = inlined_call_operand.vmem [shape: f32[4,512], index: 1, kind: output, shape index: {0}]   ;;  %s301_s2 = inlined_call_operand.hbm [shape: f32[1,1], index: 2, kind: output, shape index: {1}]   ;;  %s302_s3 = inlined_call_operand.hbm [shape: f32[1,1], index: 3, kind: output, shape index: {2}]  }
   0x1   :  { %v240_v0 = vld [vmem:[%s299_s0] sm:$0xff]  ;;  %v245_v1 = vld [vmem:[%s299_s0 + $0x8] sm:$0xff] }
   0x2   :  { %10 = vsyncpa [#allocation5], 0  ;;  %v17_v2 = vcombine.high %v240_v0, %v240_v0  ;;  %v18_v3 = vcombine.high %v245_v1, %v245_v1  ;;  %v22_v4 = vsel %vm21_vm0, %v240_v0, inf  ;;  %v36_v5 = vsel %vm21_vm0, %v245_v1, inf  ;;  %s215_s0 = smov [#allocation2]  }
   0x3   :  { %v23_v6 = vrot.slane %v22_v4, 4  ;;  %v37_v7 = vrot.slane %v36_v5, 4  ;;  %v50_v8 = vsel %vm21_vm0, %v240_v0, -inf  ;;  %v64_v9 = vsel %vm21_vm0, %v245_v1, -inf  ;;  %s132_s16 = sshll.u32 %s215_s0, 4  ;;  %s133_s16 = int_to_ptr.vmem [resolvable:$true] %s132_s16 }
   0x4   :  { %v29_v10 = vsel %vm21_vm0, %v17_v2, inf  ;;  %v43_v11 = vsel %vm21_vm0, %v18_v3, inf  ;;  %v51_v12 = vrot.slane %v50_v8, 4  ;;  %v57_v13 = vsel %vm21_vm0, %v17_v2, -inf  ;;  %s167_s17 = scalar_lea.vmem %s133_s16, 16  ;;  %s171_s18 = scalar_lea.vmem %s133_s16, 32 }
   0x5   :  { %v24_v14 = vmin.f32 %v22_v4, %v23_v6  ;;  %v30_v15 = vrot.slane %v29_v10, 4  ;;  %v38_v16 = vmin.f32 %v36_v5, %v37_v7  ;;  %v44_v17 = vrot.slane %v43_v11, 4  ;;  %p168_p0 = scmp.ne.s32.totalorder %s133_s16, %s167_s17  ;;  %p172_p1 = scmp.lt.s32.totalorder %s133_s16, %s133_s16 }
   0x6   :  { %v52_v18 = vmax.f32 %v50_v8, %v51_v12  ;;  %v58_v19 = vrot.slane %v57_v13, 4  ;;  %v65_v20 = vrot.slane %v64_v9, 4  ;;  %v71_v21 = vsel %vm21_vm0, %v18_v3, -inf  ;;  %p173_p2 = scmp.lt.s32.totalorder %s171_s18, %s167_s17 }
   0x7   :  { %v25_v22 = vrot.slane %v24_v14, 2  ;;  %v31_v23 = vmin.f32 %v29_v10, %v30_v15  ;;  %v39_v24 = vrot.slane %v38_v16, 2  ;;  %v45_v25 = vmin.f32 %v43_v11, %v44_v17 }
   0x8   :  { %v53_v26 = vrot.slane %v52_v18, 2  ;;  %v59_v27 = vmax.f32 %v57_v13, %v58_v19  ;;  %v66_v28 = vmax.f32 %v64_v9, %v65_v20  ;;  %v72_v29 = vrot.slane %v71_v21, 4  ;;  %p174_p3 = por %p173_p2, %p172_p1 }
   0x9   :  { %v26_v30 = vmin.f32 %v24_v14, %v25_v22  ;;  %v32_v31 = vrot.slane %v31_v23, 2  ;;  %v40_v32 = vmin.f32 %v38_v16, %v39_v24  ;;  %v46_v33 = vrot.slane %v45_v25, 2 }
   0xa   :  { %v54_v34 = vmax.f32 %v52_v18, %v53_v26  ;;  %v60_v35 = vrot.slane %v59_v27, 2  ;;  %v67_v36 = vrot.slane %v66_v28, 2  ;;  %v73_v37 = vmax.f32 %v71_v21, %v72_v29  ;;  %p175_p4 = pnand %p174_p3, %p168_p0 }
   0xb   :  { %v27_v38 = vrot.slane %v26_v30, 1  ;;  %v33_v39 = vmin.f32 %v31_v23, %v32_v31  ;;  %v41_v40 = vrot.slane %v40_v32, 1  ;;  %v47_v41 = vmin.f32 %v45_v25, %v46_v33 }
   0xc   :  { %v55_v42 = vrot.slane %v54_v34, 1  ;;  %v61_v43 = vmax.f32 %v59_v27, %v60_v35  ;;  %v68_v44 = vmax.f32 %v66_v28, %v67_v36  ;;  %v74_v45 = vrot.slane %v73_v37, 2 }
   0xd   :  { %v28_v46 = vmin.f32 %v26_v30, %v27_v38  ;;  %v34_v47 = vrot.slane %v33_v39, 1  ;;  %v42_v48 = vmin.f32 %v40_v32, %v41_v40  ;;  %v48_v49 = vrot.slane %v47_v41, 1 }
   0xe   :  { %v56_v50 = vmax.f32 %v54_v34, %v55_v42  ;;  %v62_v51 = vrot.slane %v61_v43, 1  ;;  %v69_v52 = vrot.slane %v68_v44, 1  ;;  %v75_v53 = vmax.f32 %v73_v37, %v74_v45 }
   0xf   :  { %v35_v54 = vmin.f32 %v33_v39, %v34_v47  ;;  %v49_v55 = vmin.f32 %v47_v41, %v48_v49  ;;  %vm121_vm1 = vcmask 0  }
  0x10   :  { %v63_v56 = vmax.f32 %v61_v43, %v62_v51  ;;  %v70_v57 = vmax.f32 %v68_v44, %v69_v52  ;;  %v76_v58 = vrot.slane %v75_v53, 1 }
  0x11   :  { %v78_v59 = vmin.f32 %v28_v46, %v35_v54  ;;  %v79_v60 = vmin.f32 %v42_v48, %v49_v55 }
  0x12   :  { %v77_v61 = vmax.f32 %v75_v53, %v76_v58  ;;  %v83_v62 = vmax.f32 %v56_v50, %v63_v56 }
  0x13   :  { %v80_v63 = vmin.f32 %v78_v59, %v79_v60 }
  0x14   :  { %v84_v2 = vmax.f32 %v70_v57, %v77_v61 }
  0x15   :  { %81 = vmin.xlane.f32.xlu0 %v80_v63 }
  0x16   :  { %v85_v3 = vmax.f32 %v83_v62, %v84_v2 }
  0x19   :  { %86 = vmax.xlane.f32.xlu0 %v85_v3 }
  0xa2   :  { %v82_v4 = vpop.xlane.xlu0 %81 }
  0xa3   :  { %v89_v6 = vmin.f32 %v82_v4, 0.0 }
  0xa6   :  { %v87_v5 = vpop.xlane.xlu0 %86 }
  0xa7   :  { %v90_v7 = vmax.f32 %v87_v5, 0.0  ;;  %vm88_vm2 = vcmp.eq.f32.partialorder %v87_v5, %v82_v4 }
  0xa9   :  { %v91_v8 = vsub.f32 %v90_v7, %v89_v6 }
  0xab   :  { %v93_v9 = vmul.f32 0.003921569, %v91_v8 }
  0xad   :  { %v94_v10 = vmax.f32 %v93_v9, 1.1920929e-07 }
  0xaf   :  { %163 = vrcp.f32 %v94_v10  ;;  %v101_v11 = vsel %vm88_vm2, 1.0, %v94_v10 }
  0xb0   :  { %122 = vst.msk [vmem:[#allocation2] sm:$0x1] %vm121_vm1, %v101_v11 }
  0xb1   :  { %178 = shalt.err (!%p175_p4)
}
  0xb2   :  { %s179_s21 = scalar_lea.hbm %s301_s2, 16 }
  0xb3   :  { %p180_p5 = scmp.ne.s32.totalorder %s301_s2, %s179_s21  ;;  %p183_p6 = scmp.lt.u32.totalorder %s179_s21, %s301_s2 }
  0xb5   :  { %p185_p7 = pnand %p183_p6, %p180_p5 }
  0xb7   :  { %188 = shalt.err (!%p185_p7)
}
  0xb8   :  { %135 = dma.vmem_to_hbm [thread:$0]  %s133_s16, 16, %s301_s2, [#allocation3]   ;;  %165 = vrcp.f32 %v101_v11 }
  0xb9   :  { %v164_v12 = vpop.eup %163  ;;  %s216_s28 = smov [#allocation4]  }
  0xba   :  { %v96_v13 = vmul.f32 %v164_v12, %v89_v6  ;;  %s142_s29 = sshll.u32 %s216_s28, 4  ;;  %s143_s29 = int_to_ptr.vmem [resolvable:$true] %s142_s29 }
  0xbb   :  { %s189_s2 = scalar_lea.vmem %s143_s29, 16  ;;  %s193_s30 = scalar_lea.vmem %s143_s29, 32 }
  0xbc   :  { %v156_v14 = vround.rtne.f32 %v96_v13  ;;  %p190_p8 = scmp.ne.s32.totalorder %s143_s29, %s189_s2  ;;  %p194_p9 = scmp.lt.s32.totalorder %s143_s29, %s143_s29 }
  0xbd   :  { %p195_p10 = scmp.lt.s32.totalorder %s193_s30, %s189_s2 }
  0xbe   :  { %v98_v15 = vsub.f32 0.0, %v156_v14 }
  0xbf   :  { %p196_p11 = por %p195_p10, %p194_p9 }
  0xc0   :  { %v99_v17 = vmax.f32 %v98_v15, 0.0 }
  0xc1   :  { %p197_p12 = pnand %p196_p11, %p190_p8 }
  0xc2   :  { %v166_v16 = vpop.eup %165  ;;  %v100_v18 = vmin.f32 %v99_v17, 255.0 }
  0xc3   :  { %v105_v19 = vmul.f32 %v166_v16, %v240_v0  ;;  %v106_v20 = vmul.f32 %v166_v16, %v245_v1 }
  0xc4   :  { %v102_v21 = vsel %vm88_vm2, 0.0, %v100_v18 }
  0xc5   :  { %v107_v22 = vadd.f32 %v105_v19, %v102_v21  ;;  %v108_v23 = vadd.f32 %v106_v20, %v102_v21  ;;  %123 = vst.msk [vmem:[#allocation4] sm:$0x1] %vm121_vm1, %v102_v21 }
  0xc6   :  { %200 = shalt.err (!%p197_p12)
}
  0xc7   :  { %s201_s6 = scalar_lea.hbm %s302_s3, 16 }
  0xc8   :  { %p202_p13 = scmp.ne.s32.totalorder %s302_s3, %s201_s6  ;;  %p205_p0 = scmp.lt.u32.totalorder %s201_s6, %s302_s3 }
  0xca   :  { %p207_p1 = pnand %p205_p0, %p202_p13 }
  0xcc   :  { %210 = shalt.err (!%p207_p1)
}
  0xcd   :  { %145 = dma.vmem_to_hbm [thread:$0]  %s143_s29, 16, %s302_s3, [#allocation5]   ;;  %v157_v0 = vround.rtne.f32 %v107_v22  ;;  %v158_v1 = vround.rtne.f32 %v108_v23 }
  0xcf   :  { %v111_v24 = vmax.f32 %v157_v0, 0.0  ;;  %v112_v25 = vmax.f32 %v158_v1, 0.0 }
  0xd1   :  { %v113_v26 = vmin.f32 %v111_v24, 255.0  ;;  %v114_v27 = vmin.f32 %v112_v25, 255.0 }
  0xd3   :  { %v115_v28 = vsub.f32 %v113_v26, %v102_v21  ;;  %v116_v29 = vsub.f32 %v114_v27, %v102_v21 }
  0xd5   :  { %v117_v30 = vmul.f32 %v115_v28, %v101_v11  ;;  %v118_v31 = vmul.f32 %v116_v29, %v101_v11 }
  0xd7   :  { %119 = vst [vmem:[%s300_s1] sm:$0xff] %v117_v30  ;;  %120 = vst [vmem:[%s300_s1 + $0x8] sm:$0xff] %v118_v31 }
  0xd8   :  { %211 = dma.done.wait [#allocation3], 16  }
  0xd9   :  { %212 = vsyncadd [#allocation3], 4294967280 }
  0xda   :  { %213 = dma.done.wait [#allocation5], 16  }
  0xdb   :  { %214 = vsyncadd [#allocation5], 4294967280 }
  0xdc   :  { %154 = vsyncpa [#allocation3], 1 }
  0xdd   :  { %155 = vsyncpa [#allocation5], 1 }

</bundles_post_ra>
